<compile_context>
chip_gen: v7x
topology: tpu7x:2x2x1
jax: 0.10.0
libtpu: 0.0.40
codegen_flags: <defaults>
</compile_context>

<pallas_src>
import jax
import jax.numpy as jnp
from jax.experimental import pallas as pl
from jax.experimental.pallas import tpu as pltpu

LANES = 128
MIN_GRID_STEPS = 4            # keep >= 2 steps per TensorCore on v7x megacore
MIN_STEP_BYTES = 256 << 10    # don't split below ~256 KiB per grid step


def _add_supp_kernel(alpha_ref, beta_ref, x_ref, g_prev_ref, g_ref, fb_ref):
    """Elementwise hot path: g = g_prev*(1-a) + x*a ; fb = b*g."""
    a = alpha_ref[0]
    b = beta_ref[0]
    one_minus_a = 1.0 - a
    # Per-tile f32 compute for parity with the f32 reference; data travels
    # HBM<->VMEM in its native dtype (casts are no-ops for f32 inputs).
    x = x_ref[...].astype(jnp.float32)
    gp = g_prev_ref[...].astype(jnp.float32)
    g = gp * one_minus_a + x * a
    g_ref[...] = g.astype(g_ref.dtype)
    fb_ref[...] = (b * g).astype(fb_ref.dtype)


def _max_tile_bytes_for_device():
    """Per-stream double-buffer tile budget, by TPU generation."""
    try:
        kind = jax.devices()[0].device_kind.lower()
    except Exception:  # pragma: no cover - defensive
        return 2 << 20
    if any(v in kind for v in ("v2", "v3", "v4", "v5")):
        return 1 << 20            # v5e: stay inside the 16 MiB scoped default
    if "v6" in kind:
        return 2 << 20            # v6e: fits 32 MiB scoped default untouched
    return 4 << 20                # v7x and newer: 3.2 TB/s HBM wants fat tiles


def _pick_tile_rows(rows, itemsize, sub, max_tile_bytes):
    """Tile height: VMEM-cap sized, sublane-aligned, grid kept >= 4 steps
    when each step still moves >= MIN_STEP_BYTES.  Never depends on `rows`
    having nice divisors (the cdiv grid clips the overhanging last block)."""
    cap = max(sub, (max_tile_bytes // (LANES * itemsize)) // sub * sub)
    quarter = -(-rows // MIN_GRID_STEPS)          # cdiv(rows, 4)
    quarter = -(-quarter // sub) * sub            # round up to sublane multiple
    min_step = max(sub, (MIN_STEP_BYTES // (LANES * itemsize)) // sub * sub)
    cand = min(cap, max(quarter, min_step))
    # If one candidate tile already covers everything, use the exact row count
    # (block == full array dim is always a legal TPU block shape).
    return rows if cand >= rows else cand


@jax.jit
def module_add_supp_forward(x_previous, g_previous, alpha, beta):
    """JAX/Pallas equivalent of module_add_supp.forward.

    x_previous, g_previous: arrays of identical shape (e.g. NCHW), float dtype.
    alpha, beta: 0-d or shape-(1,) parameters.
    Returns (g, feedback) with the input shape and promoted dtype.
    """
    out_dtype = jnp.result_type(x_previous.dtype, g_previous.dtype)
    orig_shape = x_previous.shape
    itemsize = jnp.dtype(out_dtype).itemsize
    sub = max(8, 32 // itemsize)          # 8 rows f32, 16 bf16, 32 int8/fp8

    xf = x_previous.astype(out_dtype).reshape(-1)
    gf = g_previous.astype(out_dtype).reshape(-1)
    n = xf.shape[0]

    # Lane-dense (rows, 128) view of the contiguous flat data (free reshape).
    # Only the last PARTIAL 128-lane row (n % 128 != 0, rare for NCHW) needs a
    # pad; ragged row counts are absorbed by the cdiv grid's clipped last block.
    rem = (-n) % LANES
    if rem:
        # TODO(synk): this <128-element tail still costs one pad/slice copy
        # pass per stream; only triggers when n % 128 != 0.
        xf = jnp.pad(xf, (0, rem))
        gf = jnp.pad(gf, (0, rem))
    rows = (n + rem) // LANES
    xf = xf.reshape(rows, LANES)
    gf = gf.reshape(rows, LANES)

    max_tile_bytes = _max_tile_bytes_for_device()
    tile_rows = _pick_tile_rows(rows, itemsize, sub, max_tile_bytes)
    grid = (pl.cdiv(rows, tile_rows),)
    tile_spec = pl.BlockSpec((tile_rows, LANES), lambda i: (i, 0))

    # VMEM budget: 4 tiled streams (x, g_prev, g, fb) x 2 double-buffers.
    tile_bytes = tile_rows * LANES * itemsize
    vmem_limit = int(min(48 << 20, max(16 << 20, 8 * tile_bytes + (4 << 20))))

    alpha_s = jnp.asarray(alpha, jnp.float32).reshape(1)
    beta_s = jnp.asarray(beta, jnp.float32).reshape(1)

    g_out, fb_out = pl.pallas_call(
        _add_supp_kernel,
        grid=grid,
        in_specs=[
            pl.BlockSpec(memory_space=pltpu.SMEM),  # alpha (scalar)
            pl.BlockSpec(memory_space=pltpu.SMEM),  # beta  (scalar)
            tile_spec,                              # x_previous
            tile_spec,                              # g_previous
        ],
        out_specs=[tile_spec, tile_spec],
        out_shape=[
            jax.ShapeDtypeStruct((rows, LANES), out_dtype),
            jax.ShapeDtypeStruct((rows, LANES), out_dtype),
        ],
        compiler_params=pltpu.CompilerParams(
            dimension_semantics=("parallel",),       # shard grid across v7x's 2 TCs
            vmem_limit_bytes=vmem_limit,
        ),
    )(alpha_s, beta_s, xf, gf)

    if rem:
        g_out = g_out.reshape(-1)[:n]
        fb_out = fb_out.reshape(-1)[:n]
    return g_out.reshape(orig_shape), fb_out.reshape(orig_shape)


if __name__ == "__main__":
    key = jax.random.PRNGKey(0)
    k_x, k_g, k_a, k_b = jax.random.split(key, 4)

    # Deterministic parameter init (torch.rand ~ U[0,1)).
    alpha = jax.random.uniform(k_a, (1,), dtype=jnp.float32)
    beta = jax.random.uniform(k_b, (1,), dtype=jnp.float32)

    # Case 1: typical NCHW shape (flat size multiple of 128 -> no pad path).
    x_previous = jax.random.normal(k_x, (2, 4, 16, 16), dtype=jnp.float32)
    g_previous = jax.random.normal(k_g, (2, 4, 16, 16), dtype=jnp.float32)
    g, feedback = module_add_supp_forward(x_previous, g_previous, alpha, beta)
    jax.block_until_ready((g, feedback))

    g_ref = g_previous * (1.0 - alpha[0]) + x_previous * alpha[0]
    fb_ref = beta[0] * g_ref
    assert jnp.allclose(g, g_ref, atol=1e-6, rtol=1e-6)
    assert jnp.allclose(feedback, fb_ref, atol=1e-6, rtol=1e-6)

    # Case 2: awkward shape (ragged flat size -> pad fallback + clipped block).
    x2 = jax.random.normal(k_x, (3, 5, 7, 11), dtype=jnp.float32)
    g2 = jax.random.normal(k_g, (3, 5, 7, 11), dtype=jnp.float32)
    g_b, fb_b = module_add_supp_forward(x2, g2, alpha, beta)
    jax.block_until_ready((g_b, fb_b))

    g2_ref = g2 * (1.0 - alpha[0]) + x2 * alpha[0]
    fb2_ref = beta[0] * g2_ref
    assert jnp.allclose(g_b, g2_ref, atol=1e-6, rtol=1e-6)
    assert jnp.allclose(fb_b, fb2_ref, atol=1e-6, rtol=1e-6)

    print("KERNEL_OK")
</pallas_src>

<mosaic_0001>
module attributes {stable_mosaic.version = 11 : i64} {
  func.func @_add_supp_kernel(%arg0: i32, %arg1: memref<1xf32, #tpu.memory_space<smem>>, %arg2: memref<1xf32, #tpu.memory_space<smem>>, %arg3: memref<16x128xf32, #tpu.memory_space<vmem>>, %arg4: memref<16x128xf32, #tpu.memory_space<vmem>>, %arg5: memref<16x128xf32, #tpu.memory_space<vmem>>, %arg6: memref<16x128xf32, #tpu.memory_space<vmem>>) attributes {dimension_semantics = [#tpu.dimension_semantics<parallel>], iteration_bounds = array<i64: 1>, scalar_prefetch = 0 : i64, scratch_operands = 0 : i64, tpu.core_type = #tpu.core_type<tc>, window_params = [{transform_indices = @transform_0, window_bounds = array<i64: 1>}, {transform_indices = @transform_1, window_bounds = array<i64: 1>}, {transform_indices = @transform_2, window_bounds = array<i64: 16, 128>}, {transform_indices = @transform_3, window_bounds = array<i64: 16, 128>}, {transform_indices = @transform_4, window_bounds = array<i64: 16, 128>}, {transform_indices = @transform_5, window_bounds = array<i64: 16, 128>}]} {
    %c0 = arith.constant 0 : index
    %0 = memref.load %arg1[%c0] : memref<1xf32, #tpu.memory_space<smem>>
    %c0_0 = arith.constant 0 : index
    %1 = memref.load %arg2[%c0_0] : memref<1xf32, #tpu.memory_space<smem>>
    %cst = arith.constant 1.000000e+00 : f32
    %2 = arith.subf %cst, %0 : f32
    %c0_1 = arith.constant 0 : index
    %c0_2 = arith.constant 0 : index
    %3 = vector.load %arg3[%c0_1, %c0_2] : memref<16x128xf32, #tpu.memory_space<vmem>>, vector<16x128xf32>
    %c0_3 = arith.constant 0 : index
    %c0_4 = arith.constant 0 : index
    %4 = vector.load %arg4[%c0_3, %c0_4] : memref<16x128xf32, #tpu.memory_space<vmem>>, vector<16x128xf32>
    %5 = vector.broadcast %2 : f32 to vector<16x128xf32>
    %6 = arith.mulf %4, %5 : vector<16x128xf32>
    %7 = vector.broadcast %0 : f32 to vector<16x128xf32>
    %8 = arith.mulf %3, %7 : vector<16x128xf32>
    %9 = arith.addf %6, %8 : vector<16x128xf32>
    %c0_5 = arith.constant 0 : index
    %c0_6 = arith.constant 0 : index
    %10 = vector.load %arg5[%c0_5, %c0_6] : memref<16x128xf32, #tpu.memory_space<vmem>>, vector<16x128xf32>
    tpu.vector_store %arg5[%c0_5, %c0_6], %9 {strides = array<i32>} : memref<16x128xf32, #tpu.memory_space<vmem>>, vector<16x128xf32>,
    %11 = vector.broadcast %1 : f32 to vector<16x128xf32>
    %12 = arith.mulf %11, %9 : vector<16x128xf32>
    %c0_7 = arith.constant 0 : index
    %c0_8 = arith.constant 0 : index
    %13 = vector.load %arg6[%c0_7, %c0_8] : memref<16x128xf32, #tpu.memory_space<vmem>>, vector<16x128xf32>
    tpu.vector_store %arg6[%c0_7, %c0_8], %12 {strides = array<i32>} : memref<16x128xf32, #tpu.memory_space<vmem>>, vector<16x128xf32>,
    return
  }
  func.func @transform_0(%arg0: i32) -> i32 {
    %c0_i32 = arith.constant 0 : i32
    %c0_i32_0 = arith.constant 0 : i32
    return %c0_i32 : i32
  }
  func.func @transform_1(%arg0: i32) -> i32 {
    %c0_i32 = arith.constant 0 : i32
    %c0_i32_0 = arith.constant 0 : i32
    return %c0_i32 : i32
  }
  func.func @transform_2(%arg0: i32) -> (i32, i32) {
    %c0_i32 = arith.constant 0 : i32
    %c0_i32_0 = arith.constant 0 : i32
    return %arg0, %c0_i32 : i32, i32
  }
  func.func @transform_3(%arg0: i32) -> (i32, i32) {
    %c0_i32 = arith.constant 0 : i32
    %c0_i32_0 = arith.constant 0 : i32
    return %arg0, %c0_i32 : i32, i32
  }
  func.func @transform_4(%arg0: i32) -> (i32, i32) {
    %c0_i32 = arith.constant 0 : i32
    %c0_i32_0 = arith.constant 0 : i32
    return %arg0, %c0_i32 : i32, i32
  }
  func.func @transform_5(%arg0: i32) -> (i32, i32) {
    %c0_i32 = arith.constant 0 : i32
    %c0_i32_0 = arith.constant 0 : i32
    return %arg0, %c0_i32 : i32, i32
  }
}

</mosaic_0001>

<bundles_post_ra>
// kernel: module_add_supp_forward.1
= control target key start
LH: loop header
LB: loop body
LE: loop exit
PB: predicated region body
PF: predicated region fallthrough
CT: control target
= control target key end

     0   :  { %s114_s0 = inlined_call_operand.<no memory space> [shape: f32[1], index: 0, kind: input, shape index: {}]   ;;  %s115_s2 = inlined_call_operand.vmem [shape: f32[16,128], index: 2, kind: input, shape index: {}]   ;;  %s116_s3 = inlined_call_operand.vmem [shape: f32[16,128], index: 3, kind: input, shape index: {}]   ;;  %s117_s1 = inlined_call_operand.<no memory space> [shape: f32[1], index: 1, kind: input, shape index: {}]   ;;  %s118_s4 = inlined_call_operand.vmem [shape: f32[16,128], index: 4, kind: output, shape index: {0}]   ;;  %s119_s5 = inlined_call_operand.vmem [shape: f32[16,128], index: 5, kind: output, shape index: {1}]  }
   0x1   :  { %s23_s20 = ssub.f32 1.0, %s114_s0  ;;  %v24_v0 = vld [vmem:[%s115_s2] sm:$0xff]  ;;  %v31_v2 = vstv %s114_s0  ;;  %v25_v3 = vld [vmem:[%s115_s2 + $0x8] sm:$0xff]  ;;  %v38_v10 = vstv %s117_s1 }
   0x2   :  { %v26_v1 = vld [vmem:[%s116_s3] sm:$0xff]  ;;  %v32_v4 = vmul.f32 %v31_v2, %v24_v0  ;;  %v27_v5 = vld [vmem:[%s116_s3 + $0x8] sm:$0xff]  ;;  %v33_v6 = vmul.f32 %v31_v2, %v25_v3 }
   0x3   :  { %v28_v7 = vstv %s23_s20 }
   0x4   :  { %v29_v8 = vmul.f32 %v28_v7, %v26_v1  ;;  %v30_v9 = vmul.f32 %v28_v7, %v27_v5 }
   0x6   :  { %v34_v11 = vadd.f32 %v32_v4, %v29_v8  ;;  %v35_v12 = vadd.f32 %v33_v6, %v30_v9 }
   0x8   :  { %36 = vst [vmem:[%s118_s4] sm:$0xff] %v34_v11  ;;  %37 = vst [vmem:[%s118_s4 + $0x8] sm:$0xff] %v35_v12  ;;  %v39_v13 = vmul.f32 %v38_v10, %v34_v11  ;;  %v40_v14 = vmul.f32 %v38_v10, %v35_v12 }
   0xa   :  { %41 = vst [vmem:[%s119_s5] sm:$0xff] %v39_v13  ;;  %42 = vst [vmem:[%s119_s5 + $0x8] sm:$0xff] %v40_v14 }

</bundles_post_ra>
